<compile_context>
chip_gen: v7x
topology: tpu7x:2x2x1
jax: 0.10.0
libtpu: 0.0.40
codegen_flags: <defaults>
</compile_context>

<pallas_src>
import functools

import jax
import jax.numpy as jnp
import numpy as np
from jax import lax
from jax.experimental import pallas as pl
from jax.experimental.pallas import tpu as pltpu


# ----------------------------------------------------------------------------
# helpers
# ----------------------------------------------------------------------------
_INV_SQRT2 = 0.7071067811865476


def _erf_approx(x):
    # Abramowitz & Stegun 7.1.26 rational approximation, |err| <= 1.5e-7.
    # Used instead of lax.erf so the exact-GELU path lowers on Mosaic without
    # relying on an erf primitive lowering (only exp / mul / div needed).
    a1, a2, a3 = 0.254829592, -0.284496736, 1.421413741
    a4, a5, p = -1.453152027, 1.061405429, 0.3275911
    ax = jnp.abs(x)
    t = 1.0 / (1.0 + p * ax)
    poly = ((((a5 * t + a4) * t + a3) * t + a2) * t + a1) * t
    y = 1.0 - poly * jnp.exp(-(ax * ax))
    return jnp.where(x < 0, -y, y)


def _gelu_exact(x):
    return 0.5 * x * (1.0 + _erf_approx(x * _INV_SQRT2))


def _default_vmem_limit_bytes():
    cap = None
    try:
        cap = int(pltpu.get_tpu_info().vmem_capacity_bytes)
    except Exception:  # pragma: no cover - fall back to a safe constant
        cap = None
    if cap is None or cap <= 0:
        return 48 * 1024 * 1024
    # ~48 MB on 64-MiB (v7x) parts, ~96-100 MB on 128-MiB (v5e/v6e) parts.
    return min(int(cap * 0.75), 100 * 1024 * 1024)


# ----------------------------------------------------------------------------
# call 1: fused QKV projection for the whole batch (K/V computed once)
# ----------------------------------------------------------------------------
def _qkv_projection_kernel(x_ref, wq_ref, bq_ref, wk_ref, bk_ref, wv_ref, bv_ref,
                           q_out, k_out, v_out):
    # x_ref: (1, TQ, D); outputs: (1, H, TQ, dh) head-major tiles.
    x = x_ref[0]                                   # (TQ, D), MXU operand dtype
    tq = x.shape[0]
    H, dh = q_out.shape[1], q_out.shape[3]

    def project(w_ref, b_ref, out_ref):
        y = (jnp.dot(x, w_ref[...], preferred_element_type=jnp.float32)
             + b_ref[...])                         # (TQ, D) f32 accumulation
        y = y.astype(out_ref.dtype).reshape(tq, H, dh)
        # single reshape + layout-aware transpose instead of H lane slices
        out_ref[0] = pltpu.einshape("qhd->hqd", y)

    project(wq_ref, bq_ref, q_out)   # query weights already carry 1/sqrt(dh)
    project(wk_ref, bk_ref, k_out)
    project(wv_ref, bv_ref, v_out)


# ----------------------------------------------------------------------------
# call 2: attention + out_proj + LN1 + FFN + LN2 over (batch, query-tile) grid
# ----------------------------------------------------------------------------
def _attention_ffn_kernel(x_ref, q_ref, k_ref, v_ref,
                          wo_ref, bo_ref,
                          ln1_w_ref, ln1_b_ref,
                          w1_ref, b1_ref, w2_ref, b2_ref,
                          ln2_w_ref, ln2_b_ref,
                          o_ref, ctx_ref,
                          *, head_group, norm1_eps, norm2_eps):
    H, tq, dh = q_ref.shape[1], q_ref.shape[2], q_ref.shape[3]
    D = H * dh
    cdt = q_ref.dtype                              # MXU operand / storage dtype

    # ---- per-head-group attention (bounds the live (G, TQ, S) f32 scores) ----
    for g in range(0, H, head_group):
        qg = q_ref[0, g:g + head_group]            # (G, TQ, dh), pre-scaled
        kg = k_ref[0, g:g + head_group]            # (G, S,  dh)
        vg = v_ref[0, g:g + head_group]            # (G, S,  dh)

        s = jnp.einsum("hqd,hkd->hqk", qg, kg,
                       preferred_element_type=jnp.float32)           # (G,TQ,S)
        s = s - jnp.max(s, axis=-1, keepdims=True)
        p = jnp.exp(s)
        # approx reciprocal (EUP slot); ~1e-3 rel. err, within test tolerance.
        p = p * pl.reciprocal(jnp.sum(p, axis=-1, keepdims=True), approx=True)

        ctx_ref[g:g + head_group] = jnp.einsum(
            "hqk,hkd->hqd", p.astype(cdt), vg,
            preferred_element_type=jnp.float32).astype(cdt)          # (G,TQ,dh)

    # merge heads: (H, TQ, dh) -> (TQ, H, dh) -> (TQ, D)
    attn = pltpu.einshape("hqd->qhd", ctx_ref[...]).reshape(tq, D)

    attn_out = (jnp.dot(attn, wo_ref[...], preferred_element_type=jnp.float32)
                + bo_ref[...])                                        # (TQ, D)

    # ---- residual + LayerNorm 1 (post-norm), f32 statistics -------------------
    h1 = x_ref[0].astype(jnp.float32) + attn_out
    mu1 = jnp.mean(h1, axis=-1, keepdims=True)
    var1 = jnp.mean(jnp.square(h1 - mu1), axis=-1, keepdims=True)
    h1 = (h1 - mu1) * lax.rsqrt(var1 + norm1_eps)
    h1 = h1 * ln1_w_ref[...] + ln1_b_ref[...]

    # ---- feed forward: Linear -> GELU(exact) -> Linear -------------------------
    ff = (jnp.dot(h1.astype(cdt), w1_ref[...], preferred_element_type=jnp.float32)
          + b1_ref[...])                                              # (TQ, F)
    ff = _gelu_exact(ff)
    ff = (jnp.dot(ff.astype(cdt), w2_ref[...], preferred_element_type=jnp.float32)
          + b2_ref[...])                                              # (TQ, D)

    # ---- residual + LayerNorm 2 -------------------------------------------------
    h2 = h1 + ff
    mu2 = jnp.mean(h2, axis=-1, keepdims=True)
    var2 = jnp.mean(jnp.square(h2 - mu2), axis=-1, keepdims=True)
    h2 = (h2 - mu2) * lax.rsqrt(var2 + norm2_eps)
    h2 = h2 * ln2_w_ref[...] + ln2_b_ref[...]

    o_ref[0] = h2.astype(o_ref.dtype)


# ----------------------------------------------------------------------------
# wrapper
# ----------------------------------------------------------------------------
def prophetnet_encoder_layer(x, params, *, num_heads,
                             norm1_eps=1e-5, norm2_eps=1e-5,
                             q_tile=128, head_group=4, vmem_limit_bytes=None):
    """ProphetNet BetterTransformer encoder layer.  x: (B, S, D), batch-first."""
    B, S, D = x.shape
    H = num_heads
    assert D % H == 0
    dh = D // H
    F = params["linear1_weight"].shape[0]
    cdt = x.dtype                    # MXU operand / storage dtype (bf16-ready)

    # ---- tiling / query-side padding (never materializes (S, S) scores) -------
    TQ = min(int(q_tile), S)
    TQ = ((TQ + 7) // 8) * 8                      # sublane alignment
    NQ = pl.cdiv(S, TQ)
    S_pad = NQ * TQ
    x_p = x if S_pad == S else jnp.pad(x, ((0, 0), (0, S_pad - S), (0, 0)))

    if vmem_limit_bytes is None:
        vmem_limit_bytes = _default_vmem_limit_bytes()

    # ---- one-time parameter layout prep (conversion-time work in production) --
    scale = 1.0 / float(dh) ** 0.5
    in_w = params["in_proj_weight"]               # (3D, D) = cat[q, k, v]
    in_b = params["in_proj_bias"]                 # (3D,)
    f32 = jnp.float32
    wq_t = (in_w[0:D].T * scale).astype(cdt)      # scale folded into Wq
    wk_t = in_w[D:2 * D].T.astype(cdt)
    wv_t = in_w[2 * D:3 * D].T.astype(cdt)
    bq = (in_b[0:D] * scale).astype(f32).reshape(1, D)
    bk = in_b[D:2 * D].astype(f32).reshape(1, D)
    bv = in_b[2 * D:3 * D].astype(f32).reshape(1, D)
    wo_t = params["out_proj_weight"].T.astype(cdt)
    bo = params["out_proj_bias"].astype(f32).reshape(1, D)
    w1_t = params["linear1_weight"].T.astype(cdt)      # (D, F)
    b1 = params["linear1_bias"].astype(f32).reshape(1, F)
    w2_t = params["linear2_weight"].T.astype(cdt)      # (F, D)
    b2 = params["linear2_bias"].astype(f32).reshape(1, D)
    ln1_w = params["norm1_weight"].astype(f32).reshape(1, D)
    ln1_b = params["norm1_bias"].astype(f32).reshape(1, D)
    ln2_w = params["norm2_weight"].astype(f32).reshape(1, D)
    ln2_b = params["norm2_bias"].astype(f32).reshape(1, D)

    def invariant(shape):
        # grid-invariant block: fetched once, single-buffered (no point in
        # double-buffering a block whose index never changes).
        return pl.BlockSpec(shape, lambda b, r: (0,) * len(shape),
                            pipeline_mode=pl.Buffered(1))

    compiler_params = pltpu.CompilerParams(
        dimension_semantics=("parallel", "parallel"),
        vmem_limit_bytes=int(vmem_limit_bytes),
    )

    # ---- call 1: QKV projection (K/V computed exactly once) --------------------
    head_shape = jax.ShapeDtypeStruct((B, H, S_pad, dh), cdt)
    q_h, k_h, v_h = pl.pallas_call(
        _qkv_projection_kernel,
        out_shape=(head_shape, head_shape, head_shape),
        grid=(B, NQ),
        in_specs=[
            pl.BlockSpec((1, TQ, D), lambda b, r: (b, r, 0)),
            invariant((D, D)), invariant((1, D)),      # wq_t (scaled), bq
            invariant((D, D)), invariant((1, D)),      # wk_t, bk
            invariant((D, D)), invariant((1, D)),      # wv_t, bv
        ],
        out_specs=(
            pl.BlockSpec((1, H, TQ, dh), lambda b, r: (b, 0, r, 0)),
            pl.BlockSpec((1, H, TQ, dh), lambda b, r: (b, 0, r, 0)),
            pl.BlockSpec((1, H, TQ, dh), lambda b, r: (b, 0, r, 0)),
        ),
        compiler_params=compiler_params,
    )(x_p, wq_t, bq, wk_t, bk, wv_t, bv)

    if S_pad != S:
        # drop padded key/value rows so attention never sees them (no masking).
        k_h = k_h[:, :, :S, :]
        v_h = v_h[:, :, :S, :]
    S_kv = k_h.shape[2]

    # largest divisor of H that is <= head_group
    G = max(1, min(int(head_group), H))
    while H % G:
        G -= 1

    kernel2 = functools.partial(
        _attention_ffn_kernel, head_group=G,
        norm1_eps=float(norm1_eps), norm2_eps=float(norm2_eps),
    )

    # ---- call 2: attention + out_proj + LN1 + FFN + LN2 ------------------------
    out = pl.pallas_call(
        kernel2,
        out_shape=jax.ShapeDtypeStruct((B, S_pad, D), x.dtype),
        grid=(B, NQ),
        in_specs=[
            pl.BlockSpec((1, TQ, D), lambda b, q: (b, q, 0)),          # residual x
            pl.BlockSpec((1, H, TQ, dh), lambda b, q: (b, 0, q, 0)),   # q tile
            pl.BlockSpec((1, H, S_kv, dh), lambda b, q: (b, 0, 0, 0)),  # full K
            pl.BlockSpec((1, H, S_kv, dh), lambda b, q: (b, 0, 0, 0)),  # full V
            invariant((D, D)), invariant((1, D)),      # wo_t, bo
            invariant((1, D)), invariant((1, D)),      # ln1_w, ln1_b
            invariant((D, F)), invariant((1, F)),      # w1_t, b1
            invariant((F, D)), invariant((1, D)),      # w2_t, b2
            invariant((1, D)), invariant((1, D)),      # ln2_w, ln2_b
        ],
        out_specs=pl.BlockSpec((1, TQ, D), lambda b, q: (b, q, 0)),
        scratch_shapes=[pltpu.VMEM((H, TQ, dh), cdt)],
        compiler_params=compiler_params,
    )(x_p, q_h, k_h, v_h,
      wo_t, bo, ln1_w, ln1_b, w1_t, b1, w2_t, b2, ln2_w, ln2_b)

    return out if S_pad == S else out[:, :S]


# ------------------------------ pure-JAX reference ------------------------------
def _reference(x, params, *, num_heads, norm1_eps=1e-5, norm2_eps=1e-5):
    B, S, D = x.shape
    H = num_heads
    dh = D // H
    scale = 1.0 / float(dh) ** 0.5

    qkv = x @ params["in_proj_weight"].T + params["in_proj_bias"]
    q, k, v = jnp.split(qkv, 3, axis=-1)

    def split_heads(t):
        return t.reshape(B, S, H, dh).transpose(0, 2, 1, 3)   # (B, H, S, dh)

    qh, kh, vh = split_heads(q), split_heads(k), split_heads(v)
    s = jnp.einsum("bhqd,bhkd->bhqk", qh, kh) * scale
    p = jax.nn.softmax(s, axis=-1)
    attn = jnp.einsum("bhqk,bhkd->bhqd", p, vh).transpose(0, 2, 1, 3).reshape(B, S, D)
    attn = attn @ params["out_proj_weight"].T + params["out_proj_bias"]

    def ln(t, w, b, eps):
        mu = jnp.mean(t, axis=-1, keepdims=True)
        var = jnp.mean((t - mu) ** 2, axis=-1, keepdims=True)
        return (t - mu) * lax.rsqrt(var + eps) * w + b

    h1 = ln(x + attn, params["norm1_weight"], params["norm1_bias"], norm1_eps)
    ff = jax.nn.gelu(h1 @ params["linear1_weight"].T + params["linear1_bias"],
                     approximate=False)
    ff = ff @ params["linear2_weight"].T + params["linear2_bias"]
    return ln(h1 + ff, params["norm2_weight"], params["norm2_bias"], norm2_eps)


if __name__ == "__main__":
    # small, module-consistent shapes
    B, S, D, H = 2, 16, 64, 4          # batch, seq, embed_dim, num_attn_heads
    F = 4 * D                          # feed-forward intermediate dim

    key = jax.random.PRNGKey(0)
    ks = jax.random.split(key, 16)

    def w(k, shape, scale=0.02):
        return (scale * jax.random.normal(k, shape)).astype(jnp.float32)

    params = {
        "in_proj_weight": w(ks[0], (3 * D, D)),
        "in_proj_bias": w(ks[1], (3 * D,)),
        "out_proj_weight": w(ks[2], (D, D)),
        "out_proj_bias": w(ks[3], (D,)),
        "norm1_weight": jnp.ones((D,), jnp.float32) + w(ks[4], (D,)),
        "norm1_bias": w(ks[5], (D,)),
        "norm2_weight": jnp.ones((D,), jnp.float32) + w(ks[6], (D,)),
        "norm2_bias": w(ks[7], (D,)),
        "linear1_weight": w(ks[8], (F, D)),
        "linear1_bias": w(ks[9], (F,)),
        "linear2_weight": w(ks[10], (D, F)),
        "linear2_bias": w(ks[11], (D,)),
    }

    # case 1: S divisible by the query tile (q_tile=8 -> 2x2 grid)
    x = jax.random.normal(ks[12], (B, S, D), dtype=jnp.float32)
    out = jax.block_until_ready(
        prophetnet_encoder_layer(x, params, num_heads=H, q_tile=8))
    ref = _reference(x, params, num_heads=H)
    np.testing.assert_allclose(np.asarray(out), np.asarray(ref), atol=2e-3, rtol=2e-3)

    # case 2: S not divisible by the tile -> query-side padding path
    x2 = jax.random.normal(ks[13], (B, 24, D), dtype=jnp.float32)
    out2 = jax.block_until_ready(
        prophetnet_encoder_layer(x2, params, num_heads=H, q_tile=16))
    ref2 = _reference(x2, params, num_heads=H)
    np.testing.assert_allclose(np.asarray(out2), np.asarray(ref2), atol=2e-3, rtol=2e-3)

    print("KERNEL_OK")
</pallas_src>

<mosaic_0001>
module attributes {stable_mosaic.version = 11 : i64} {
  func.func @_qkv_projection_kernel(%arg0: i32, %arg1: i32, %arg2: memref<1x8x64xf32, #tpu.memory_space<vmem>>, %arg3: memref<64x64xf32, #tpu.memory_space<vmem>>, %arg4: memref<1x64xf32, #tpu.memory_space<vmem>>, %arg5: memref<64x64xf32, #tpu.memory_space<vmem>>, %arg6: memref<1x64xf32, #tpu.memory_space<vmem>>, %arg7: memref<64x64xf32, #tpu.memory_space<vmem>>, %arg8: memref<1x64xf32, #tpu.memory_space<vmem>>, %arg9: memref<1x4x8x16xf32, #tpu.memory_space<vmem>>, %arg10: memref<1x4x8x16xf32, #tpu.memory_space<vmem>>, %arg11: memref<1x4x8x16xf32, #tpu.memory_space<vmem>>) attributes {dimension_semantics = [#tpu.dimension_semantics<parallel>, #tpu.dimension_semantics<parallel>], iteration_bounds = array<i64: 2, 2>, scalar_prefetch = 0 : i64, scratch_operands = 0 : i64, tpu.core_type = #tpu.core_type<tc>, window_params = [{transform_indices = @transform_0, window_bounds = array<i64: 1, 8, 64>}, {pipeline_mode = #tpu.pipeline_mode<synchronous>, transform_indices = @transform_1, window_bounds = array<i64: 64, 64>}, {pipeline_mode = #tpu.pipeline_mode<synchronous>, transform_indices = @transform_2, window_bounds = array<i64: 1, 64>}, {pipeline_mode = #tpu.pipeline_mode<synchronous>, transform_indices = @transform_3, window_bounds = array<i64: 64, 64>}, {pipeline_mode = #tpu.pipeline_mode<synchronous>, transform_indices = @transform_4, window_bounds = array<i64: 1, 64>}, {pipeline_mode = #tpu.pipeline_mode<synchronous>, transform_indices = @transform_5, window_bounds = array<i64: 64, 64>}, {pipeline_mode = #tpu.pipeline_mode<synchronous>, transform_indices = @transform_6, window_bounds = array<i64: 1, 64>}, {transform_indices = @transform_7, window_bounds = array<i64: 1, 4, 8, 16>}, {transform_indices = @transform_8, window_bounds = array<i64: 1, 4, 8, 16>}, {transform_indices = @transform_9, window_bounds = array<i64: 1, 4, 8, 16>}]} {
    %c0 = arith.constant 0 : index
    %c0_0 = arith.constant 0 : index
    %c0_1 = arith.constant 0 : index
    %0 = vector.load %arg2[%c0, %c0_0, %c0_1] : memref<1x8x64xf32, #tpu.memory_space<vmem>>, vector<1x8x64xf32>
    %1 = vector.shape_cast %0 : vector<1x8x64xf32> to vector<8x64xf32>
    %c0_2 = arith.constant 0 : index
    %c0_3 = arith.constant 0 : index
    %2 = vector.load %arg3[%c0_2, %c0_3] : memref<64x64xf32, #tpu.memory_space<vmem>>, vector<64x64xf32>
    %cst = arith.constant dense<0.000000e+00> : vector<8x64xf32>
    %3 = tpu.matmul %1, %2, %cst {dimension_numbers = #tpu.dot_dimension_numbers<[1], [0], [0], [1], [0, 0, 1, 1], [], []>} : vector<8x64xf32>, vector<64x64xf32>, vector<8x64xf32> -> vector<8x64xf32>
    %c0_4 = arith.constant 0 : index
    %c0_5 = arith.constant 0 : index
    %4 = vector.load %arg4[%c0_4, %c0_5] : memref<1x64xf32, #tpu.memory_space<vmem>>, vector<1x64xf32>
    %5 = vector.broadcast %4 : vector<1x64xf32> to vector<8x64xf32>
    %6 = arith.addf %3, %5 : vector<8x64xf32>
    %7 = vector.shape_cast %6 : vector<8x64xf32> to vector<8x4x16xf32>
    %8 = tpu.transpose %7, [1, 0, 2] : vector<8x4x16xf32> -> vector<4x8x16xf32>
    %c0_6 = arith.constant 0 : index
    %c0_7 = arith.constant 0 : index
    %c0_8 = arith.constant 0 : index
    %c0_9 = arith.constant 0 : index
    %9 = vector.load %arg9[%c0_6, %c0_7, %c0_8, %c0_9] : memref<1x4x8x16xf32, #tpu.memory_space<vmem>>, vector<1x4x8x16xf32>
    %10 = vector.shape_cast %9 : vector<1x4x8x16xf32> to vector<4x8x16xf32>
    %11 = vector.shape_cast %8 : vector<4x8x16xf32> to vector<1x4x8x16xf32>
    tpu.vector_store %arg9[%c0_6, %c0_7, %c0_8, %c0_9], %11 {strides = array<i32>} : memref<1x4x8x16xf32, #tpu.memory_space<vmem>>, vector<1x4x8x16xf32>,
    %c0_10 = arith.constant 0 : index
    %c0_11 = arith.constant 0 : index
    %12 = vector.load %arg5[%c0_10, %c0_11] : memref<64x64xf32, #tpu.memory_space<vmem>>, vector<64x64xf32>
    %cst_12 = arith.constant dense<0.000000e+00> : vector<8x64xf32>
    %13 = tpu.matmul %1, %12, %cst_12 {dimension_numbers = #tpu.dot_dimension_numbers<[1], [0], [0], [1], [0, 0, 1, 1], [], []>} : vector<8x64xf32>, vector<64x64xf32>, vector<8x64xf32> -> vector<8x64xf32>
    %c0_13 = arith.constant 0 : index
    %c0_14 = arith.constant 0 : index
    %14 = vector.load %arg6[%c0_13, %c0_14] : memref<1x64xf32, #tpu.memory_space<vmem>>, vector<1x64xf32>
    %15 = vector.broadcast %14 : vector<1x64xf32> to vector<8x64xf32>
    %16 = arith.addf %13, %15 : vector<8x64xf32>
    %17 = vector.shape_cast %16 : vector<8x64xf32> to vector<8x4x16xf32>
    %18 = tpu.transpose %17, [1, 0, 2] : vector<8x4x16xf32> -> vector<4x8x16xf32>
    %c0_15 = arith.constant 0 : index
    %c0_16 = arith.constant 0 : index
    %c0_17 = arith.constant 0 : index
    %c0_18 = arith.constant 0 : index
    %19 = vector.load %arg10[%c0_15, %c0_16, %c0_17, %c0_18] : memref<1x4x8x16xf32, #tpu.memory_space<vmem>>, vector<1x4x8x16xf32>
    %20 = vector.shape_cast %19 : vector<1x4x8x16xf32> to vector<4x8x16xf32>
    %21 = vector.shape_cast %18 : vector<4x8x16xf32> to vector<1x4x8x16xf32>
    tpu.vector_store %arg10[%c0_15, %c0_16, %c0_17, %c0_18], %21 {strides = array<i32>} : memref<1x4x8x16xf32, #tpu.memory_space<vmem>>, vector<1x4x8x16xf32>,
    %c0_19 = arith.constant 0 : index
    %c0_20 = arith.constant 0 : index
    %22 = vector.load %arg7[%c0_19, %c0_20] : memref<64x64xf32, #tpu.memory_space<vmem>>, vector<64x64xf32>
    %cst_21 = arith.constant dense<0.000000e+00> : vector<8x64xf32>
    %23 = tpu.matmul %1, %22, %cst_21 {dimension_numbers = #tpu.dot_dimension_numbers<[1], [0], [0], [1], [0, 0, 1, 1], [], []>} : vector<8x64xf32>, vector<64x64xf32>, vector<8x64xf32> -> vector<8x64xf32>
    %c0_22 = arith.constant 0 : index
    %c0_23 = arith.constant 0 : index
    %24 = vector.load %arg8[%c0_22, %c0_23] : memref<1x64xf32, #tpu.memory_space<vmem>>, vector<1x64xf32>
    %25 = vector.broadcast %24 : vector<1x64xf32> to vector<8x64xf32>
    %26 = arith.addf %23, %25 : vector<8x64xf32>
    %27 = vector.shape_cast %26 : vector<8x64xf32> to vector<8x4x16xf32>
    %28 = tpu.transpose %27, [1, 0, 2] : vector<8x4x16xf32> -> vector<4x8x16xf32>
    %c0_24 = arith.constant 0 : index
    %c0_25 = arith.constant 0 : index
    %c0_26 = arith.constant 0 : index
    %c0_27 = arith.constant 0 : index
    %29 = vector.load %arg11[%c0_24, %c0_25, %c0_26, %c0_27] : memref<1x4x8x16xf32, #tpu.memory_space<vmem>>, vector<1x4x8x16xf32>
    %30 = vector.shape_cast %29 : vector<1x4x8x16xf32> to vector<4x8x16xf32>
    %31 = vector.shape_cast %28 : vector<4x8x16xf32> to vector<1x4x8x16xf32>
    tpu.vector_store %arg11[%c0_24, %c0_25, %c0_26, %c0_27], %31 {strides = array<i32>} : memref<1x4x8x16xf32, #tpu.memory_space<vmem>>, vector<1x4x8x16xf32>,
    return
  }
  func.func @transform_0(%arg0: i32, %arg1: i32) -> (i32, i32, i32) {
    %c0_i32 = arith.constant 0 : i32
    %c0_i32_0 = arith.constant 0 : i32
    return %arg0, %arg1, %c0_i32 : i32, i32, i32
  }
  func.func @transform_1(%arg0: i32, %arg1: i32) -> (i32, i32) {
    %c0_i32 = arith.constant 0 : i32
    %c0_i32_0 = arith.constant 0 : i32
    %c0_i32_1 = arith.constant 0 : i32
    return %c0_i32, %c0_i32_0 : i32, i32
  }
  func.func @transform_2(%arg0: i32, %arg1: i32) -> (i32, i32) {
    %c0_i32 = arith.constant 0 : i32
    %c0_i32_0 = arith.constant 0 : i32
    %c0_i32_1 = arith.constant 0 : i32
    return %c0_i32, %c0_i32_0 : i32, i32
  }
  func.func @transform_3(%arg0: i32, %arg1: i32) -> (i32, i32) {
    %c0_i32 = arith.constant 0 : i32
    %c0_i32_0 = arith.constant 0 : i32
    %c0_i32_1 = arith.constant 0 : i32
    return %c0_i32, %c0_i32_0 : i32, i32
  }
  func.func @transform_4(%arg0: i32, %arg1: i32) -> (i32, i32) {
    %c0_i32 = arith.constant 0 : i32
    %c0_i32_0 = arith.constant 0 : i32
    %c0_i32_1 = arith.constant 0 : i32
    return %c0_i32, %c0_i32_0 : i32, i32
  }
  func.func @transform_5(%arg0: i32, %arg1: i32) -> (i32, i32) {
    %c0_i32 = arith.constant 0 : i32
    %c0_i32_0 = arith.constant 0 : i32
    %c0_i32_1 = arith.constant 0 : i32
    return %c0_i32, %c0_i32_0 : i32, i32
  }
  func.func @transform_6(%arg0: i32, %arg1: i32) -> (i32, i32) {
    %c0_i32 = arith.constant 0 : i32
    %c0_i32_0 = arith.constant 0 : i32
    %c0_i32_1 = arith.constant 0 : i32
    return %c0_i32, %c0_i32_0 : i32, i32
  }
  func.func @transform_7(%arg0: i32, %arg1: i32) -> (i32, i32, i32, i32) {
    %c0_i32 = arith.constant 0 : i32
    %c0_i32_0 = arith.constant 0 : i32
    %c0_i32_1 = arith.constant 0 : i32
    return %arg0, %c0_i32, %arg1, %c0_i32_0 : i32, i32, i32, i32
  }
  func.func @transform_8(%arg0: i32, %arg1: i32) -> (i32, i32, i32, i32) {
    %c0_i32 = arith.constant 0 : i32
    %c0_i32_0 = arith.constant 0 : i32
    %c0_i32_1 = arith.constant 0 : i32
    return %arg0, %c0_i32, %arg1, %c0_i32_0 : i32, i32, i32, i32
  }
  func.func @transform_9(%arg0: i32, %arg1: i32) -> (i32, i32, i32, i32) {
    %c0_i32 = arith.constant 0 : i32
    %c0_i32_0 = arith.constant 0 : i32
    %c0_i32_1 = arith.constant 0 : i32
    return %arg0, %c0_i32, %arg1, %c0_i32_0 : i32, i32, i32, i32
  }
}

</mosaic_0001>

<bundles_post_ra>
// kernel: tpu_custom_call.1
= control target key start
LH: loop header
LB: loop body
LE: loop exit
PB: predicated region body
PF: predicated region fallthrough
CT: control target
= control target key end

     0   :  { %s2540_s0 = inlined_call_operand.hbm [shape: f32[2,16,64], index: 0, kind: input, shape index: {}]   ;;  %s2541_s1 = inlined_call_operand.hbm [shape: f32[64,64], index: 1, kind: input, shape index: {}]   ;;  %s2542_s2 = inlined_call_operand.vmem [shape: f32[1,64], index: 2, kind: input, shape index: {}]   ;;  %s2543_s3 = inlined_call_operand.hbm [shape: f32[64,64], index: 3, kind: input, shape index: {}]   ;;  %s2544_s4 = inlined_call_operand.vmem [shape: f32[1,64], index: 4, kind: input, shape index: {}]   ;;  %s2545_s5 = inlined_call_operand.hbm [shape: f32[64,64], index: 5, kind: input, shape index: {}]   ;;  %s2546_s6 = inlined_call_operand.vmem [shape: f32[1,64], index: 6, kind: input, shape index: {}]   ;;  %s2547_s7 = inlined_call_operand.hbm [shape: f32[2,4,16,16], index: 7, kind: output, shape index: {0}]   ;;  %s2548_s8 = inlined_call_operand.hbm [shape: f32[2,4,16,16], index: 8, kind: output, shape index: {1}]   ;;  %s2549_s9 = inlined_call_operand.hbm [shape: f32[2,4,16,16], index: 9, kind: output, shape index: {2}]  }
   0x1   :  { %2561 = sst [smem:[#allocation23_spill]] %s2541_s1 }
   0x2   :  { %2562 = sst [smem:[#allocation24_spill]] %s2543_s3 }
   0x3   :  { %2563 = sst [smem:[#allocation25_spill]] %s2545_s5 }
   0x4   :  { %2564 = sst [smem:[#allocation26_spill]] %s2547_s7 }
   0x5   :  { %2565 = sst [smem:[#allocation27_spill]] %s2548_s8 }
   0x6   :  { %2566 = sst [smem:[#allocation28_spill]] %s2549_s9 }
   0x7   :  { %15 = vsyncpa [#allocation3], 0 }
   0x8   :  { %17 = vsyncpa [#allocation3 + $0x1], 0 }
   0x9   :  { %18 = vsyncpa [#allocation6], 0 }
   0xa   :  { %19 = vsyncpa [#allocation9], 0 }
   0xb   :  { %20 = vsyncpa [#allocation4], 0 }
   0xc   :  { %22 = vsyncpa [#allocation4 + $0x1], 0 }
   0xd   :  { %23 = vsyncpa [#allocation12], 0 }
   0xe   :  { %25 = vsyncpa [#allocation12 + $0x1], 0  ;;  %s2029_s30 = smov 0   ;;  %s2031_s10 = smov 0  }
   0xf   :  { %s2033_s11 = smov 0   ;;  %s2035_s12 = smov 0  }
  0x10   :  { %s2037_s13 = smov 0   ;;  %s2039_s14 = smov 0  }
  0x11   :  { %s2041_s15 = smov 0   ;;  %s2043_s16 = smov 0  }
  0x12 LB: > { %2567 = sst [smem:[#allocation19_spill]] %s1929_s30  ;;  %s2070_s17 = sadd.s32 4294967295, %s1957_s16   ;;  %s1957_s16 = sphi %s2043_s16, %s31_s16   ;;  %s1953_s15 = sphi %s2041_s15, %s2607_s15   ;;  %s1949_s14 = sphi %s2039_s14, %s2606_s14   ;;  %s1945_s13 = sphi %s2037_s13, %s2605_s13   ;;  %s1941_s12 = sphi %s2035_s12, %s2604_s12   ;;  %s1937_s11 = sphi %s2033_s11, %s2603_s11   ;;  %s1933_s10 = sphi %s2031_s10, %s2602_s10   ;;  %s1929_s30 = sphi %s2029_s30, %s2601_s30  }
  0x13   : > { %2568 = sst [smem:[#allocation20_spill]] %s1941_s12  ;;  %s2550_s18 = sadd.s32 4294967294, %s1957_s16  }
  0x14   : > { %2569 = sst [smem:[#allocation21_spill]] %s1945_s13  ;;  %p65_p0 = scmp.ne.s32.totalorder %s1933_s10, %s1929_s30 }
  0x15   : > { %p2554_p1 = scmp.eq.s32.totalorder %s2070_s17, 0  ;;  %p223_p3 = scmp.eq.s32.totalorder %s2550_s18, 3 }
  0x16   : > { %p1386_p5 = scmp.ge.s32.totalorder %s1957_s16, 1  ;;  %p286_p7 = scmp.lt.s32.totalorder %s1957_s16, 5 }
  0x17   : > { %p2081_p4 = por %p2554_p1, %p65_p0  ;;  %p2086_p6 = por %p223_p3, %p65_p0 }
  0x18   : > { %p2091_p8 = pnand %p1386_p5, %p286_p7  ;;  %s1959_s22 = smov [#allocation5]  }
  0x19   : > { %s2570_s19 = scalar_select %p2081_p4, 1, 0 }
  0x1a   : > { %s2571_s20 = scalar_select %p2086_p6, 1, 0 }
  0x1b   : > { %s2573_s21 = scalar_select %p2091_p8, 1, 0 }
  0x1c   : > { %2572 = sst [smem:[#allocation22_spill]] %s2571_s20  ;;  %s298_s23 = sshll.u32 %s1959_s22, 4  ;;  %s2095_s23 = int_to_ptr.vmem [resolvable:$true] %s298_s23 }
  0x1d   : > { %p1565_p9 = pneg %p2091_p8  ;;  %s1960_s25 = smov [#allocation7]  }
  0x1e   : > { %s314_s26 = sshll.u32 %s1960_s25, 4  ;;  %s1961_s27 = smov [#allocation8]   ;;  %s2105_s26 = int_to_ptr.vmem [resolvable:$true] %s314_s26 }
  0x1f   : > { %p2101_p10 = pnand %p1565_p9, %p2554_p1  ;;  %s2107_s28 = sshll.u32 %s1961_s27, 4  ;;  %s331_s28 = int_to_ptr.vmem [resolvable:$true] %s2107_s28 }
  0x20   : > { %s2575_s1 = sld [smem:[#allocation23_spill]] }
  0x21   : > { %p2117_p12 = pneg %p2101_p10 }
  0x26   : > { %s1677_s22 = scalar_lea.hbm %s2575_s1, 1024 }
  0x27   : > { %p1678_p11 = scmp.ne.s32.totalorder %s2575_s1, %s1677_s22  ;;  %p1684_p3 = scmp.lt.u32.totalorder %s1677_s22, %s2575_s1 }
  0x29   : > { %p1680_p13 = pnand %p2117_p12, %p1678_p11 }
  0x2b   : > { %p1681_p0 = pneg %p1680_p13 }
  0x2d   : > { %p1686_p5 = pnand %p1684_p3, %p1681_p0 }
  0x2f   : > { %1689 = shalt.err (!%p1686_p5)
}
  0x30   : > { %s1690_s30 = scalar_lea.vmem %s2095_s23, 1024  ;;  %p1698_p2 = scmp.lt.s32.totalorder %s2095_s23, %s2095_s23 }
  0x31   : > { %p1691_p7 = scmp.ne.s32.totalorder %s2095_s23, %s1690_s30  ;;  %p1699_p6 = scmp.lt.s32.totalorder %s1690_s30, %s1690_s30 }
  0x33   : > { %p1693_p9 = pnand %p1691_p7, %p2117_p12  ;;  %p1700_p11 = por %p1699_p6, %p1698_p2 }
  0x35   : > { %p1694_p1 = pneg %p1693_p9 }
  0x37   : > { %p1701_p13 = pnand %p1700_p11, %p1694_p1 }
  0x39   : > { %1704 = shalt.err (!%p1701_p13)
}
  0x3a   : > { %s1962_s18 = smov 128   ;;  %s1963_s20 = smov 8  }
  0x3b   : > { %1568 = dma.hbm_to_vmem [thread:$0]  (!%p2101_p10), %s2575_s1, 1024, %s2095_s23, [#allocation6], %s1962_s18, %s1962_s18, %s1963_s20  }
  0x3c   : > { %s2577_s3 = sld [smem:[#allocation24_spill]] }
  0x42   : > { %s1705_s30 = scalar_lea.hbm %s2577_s3, 1024 }
  0x43   : > { %p1706_p1 = scmp.ne.s32.totalorder %s2577_s3, %s1705_s30  ;;  %p1712_p0 = scmp.lt.u32.totalorder %s1705_s30, %s2577_s3 }
  0x45   : > { %p1708_p2 = pnand %p1706_p1, %p2117_p12 }
  0x47   : > { %p1709_p6 = pneg %p1708_p2 }
  0x49   : > { %p1714_p3 = pnand %p1712_p0, %p1709_p6 }
  0x4b   : > { %1717 = shalt.err (!%p1714_p3)
}
  0x4c   : > { %s1718_s23 = scalar_lea.vmem %s2105_s26, 1024  ;;  %p1726_p11 = scmp.lt.s32.totalorder %s2105_s26, %s2105_s26 }
  0x4d   : > { %p1719_p5 = scmp.ne.s32.totalorder %s2105_s26, %s1718_s23  ;;  %p1727_p13 = scmp.lt.s32.totalorder %s1718_s23, %s1718_s23 }
  0x4f   : > { %p1721_p7 = pnand %p1719_p5, %p2117_p12  ;;  %p1728_p1 = por %p1727_p13, %p1726_p11 }
  0x51   : > { %p1722_p9 = pneg %p1721_p7 }
  0x53   : > { %p1729_p2 = pnand %p1728_p1, %p1722_p9 }
  0x55   : > { %1732 = shalt.err (!%p1729_p2)
}
  0x56   : > { %1571 = dma.hbm_to_vmem [thread:$0]  (!%p2101_p10), %s2577_s3, 1024, %s2105_s26, [#allocation6], %s1962_s18, %s1962_s18, %s1963_s20  }
  0x57   : > { %s2578_s5 = sld [smem:[#allocation25_spill]] }
  0x5d   : > { %s1733_s29 = scalar_lea.hbm %s2578_s5, 1024 }
  0x5e   : > { %p1734_p6 = scmp.ne.s32.totalorder %s2578_s5, %s1733_s29  ;;  %p1740_p5 = scmp.lt.u32.totalorder %s1733_s29, %s2578_s5 }
  0x60   : > { %p1736_p0 = pnand %p1734_p6, %p2117_p12 }
  0x62   : > { %p1737_p3 = pneg %p1736_p0 }
  0x64   : > { %p1742_p7 = pnand %p1740_p5, %p1737_p3 }
  0x66   : > { %1745 = shalt.err (!%p1742_p7)
}
  0x67   : > { %s1746_s23 = scalar_lea.vmem %s331_s28, 1024  ;;  %p1754_p1 = scmp.lt.s32.totalorder %s331_s28, %s331_s28 }
  0x68   : > { %p1747_p9 = scmp.ne.s32.totalorder %s331_s28, %s1746_s23  ;;  %p1755_p2 = scmp.lt.s32.totalorder %s1746_s23, %s1746_s23 }
  0x6a   : > { %p1749_p11 = pnand %p1747_p9, %p2117_p12  ;;  %p1756_p4 = por %p1755_p2, %p1754_p1 }
  0x6c   : > { %p1750_p13 = pneg %p1749_p11 }
  0x6e   : > { %p1757_p8 = pnand %p1756_p4, %p1750_p13 }
  0x70   : > { %1760 = shalt.err (!%p1757_p8)
}
  0x71   : > { %1574 = dma.hbm_to_vmem [thread:$0]  (!%p2101_p10), %s2578_s5, 1024, %s331_s28, [#allocation9], %s1962_s18, %s1962_s18, %s1963_s20  }
  0x72   : > { %s40_s9 = sadd.s32 1, %s1949_s14  ;;  %s43_s24 = sadd.s32 1, %s1953_s15 }
  0x73   : > { %p41_p4 = scmp.ge.s32.totalorder %s40_s9, 2  ;;  %s52_s8 = sadd.s32 1, %s1937_s11 }
  0x74   : > { %p59_p8 = scmp.ne.s32.totalorder %s1937_s11, %s1933_s10  ;;  %p60_p12 = scmp.eq.s32.totalorder %s1957_s16, 0 }
  0x75   : > { %s2609_s9 = smov (%p41_p4, %s40_s9), 0  ;;  %s2611_s24 = smov (!%p41_p4, %s43_s24), %s1953_s15 }
  0x76   : > { %s48_s12 = ssub.s32 %s1949_s14, %s2609_s9  ;;  %p45_p6 = scmp.ge.s32.totalorder %s2611_s24, 2 }
  0x77   : > { %p2579_p0 = scmp.eq.s32.totalorder %s2070_s17, 3  ;;  %p2206_p10 = por %p60_p12, %p59_p8 }
  0x78   : > { %p1592_p5 = scmp.lt.s32.totalorder %s1957_s16, 4  ;;  %s2613_s24 = smov (%p45_p6, %s2611_s24), 0 }
  0x79   : > { %p2202_p3 = por %p2579_p0, %p59_p8  ;;  %s347_s18 = sand.u32 1, %s1937_s11  }
  0x7a   : > { %s1392_s20 = sshll.u32 %s1953_s15, 1  ;;  %s47_s29 = ssub.s32 %s1953_s15, %s2613_s24 }
  0x7b   : > { %s49_s22 = sor.u32 %s48_s12, %s47_s29  ;;  %s1391_s25 = sshll.u32 %s347_s18, 3 }
  0x7c   : > { %p50_p7 = scmp.eq.s32.totalorder %s49_s22, 0  ;;  %s356_s27 = sadd.s32 %s1949_s14, %s1392_s20 }
  0x7d   : > { %s351_s30 = scalar_lea.vmem [#allocation2], %s1391_s25  ;;  %s1393_s7 = sshll.u32 %s356_s27, 7 }
  0x7e   : > { %s360_s23 = sshll.u32 %s351_s30, 4  ;;  %s2226_s5 = scalar_lea.hbm %s2540_s0, %s1393_s7  ;;  %s2221_s23 = int_to_ptr.vmem [resolvable:$true] %s360_s23 }
  0x7f   : > { %s2219_s26 = scalar_select %p50_p7, %s1937_s11, %s52_s8  }
  0x80   : > { %p2232_p9 = pnand %p1592_p5, %p2206_p10  ;;  %s348_s8 = scalar_lea.sflag [#allocation3], %s347_s18 }
  0x81   : > { %s1761_s20 = scalar_lea.hbm %s2226_s5, 128  ;;  %s1766_s28 = scalar_lea.hbm %s2540_s0, 512 }
  0x82   : > { %p1762_p11 = scmp.ne.s32.totalorder %s2226_s5, %s1761_s20  ;;  %p1763_p13 = pneg %p2232_p9 }
  0x83   : > { %p1767_p4 = scmp.lt.u32.totalorder %s2226_s5, %s2540_s0  ;;  %p1768_p8 = scmp.lt.u32.totalorder %s1766_s28, %s1761_s20 }
  0x84   : > { %p1764_p1 = pnand %p1763_p13, %p1762_p11  ;;  %p1770_p6 = scmp.lt.u32.totalorder %s1761_s20, %s2226_s5 }
  0x85   : > { %p1769_p12 = por %p1768_p8, %p1767_p4 }
  0x86   : > { %p1765_p2 = pneg %p1764_p1 }
  0x87   : > { %p1771_p0 = por %p1770_p6, %p1769_p12 }
  0x89   : > { %p1772_p10 = pnand %p1771_p0, %p1765_p2 }
  0x8b   : > { %1775 = shalt.err (!%p1772_p10)
}
  0x8c   : > { %s1776_s18 = scalar_lea.vmem %s2221_s23, 128  ;;  %s1964_s25 = smov [#allocation2]  }
  0x8d   : > { %p1777_p5 = scmp.ne.s32.totalorder %s2221_s23, %s1776_s18  ;;  %s1781_s27 = sshll.u32 %s1964_s25, 4  ;;  %s1782_s27 = int_to_ptr.vmem [resolvable:$false] %s1781_s27 }
  0x8e   : > { %s1783_s30 = scalar_lea.vmem %s1782_s27, 256  ;;  %p1784_p1 = scmp.lt.s32.totalorder %s2221_s23, %s1782_s27 }
  0x8f   : > { %p1779_p7 = pnand %p1777_p5, %p1763_p13  ;;  %p1785_p4 = scmp.lt.s32.totalorder %s1783_s30, %s1776_s18 }
  0x91   : > { %p1780_p11 = pneg %p1779_p7  ;;  %p1786_p8 = por %p1785_p4, %p1784_p1 }
  0x93   : > { %p1787_p12 = pnand %p1786_p8, %p1780_p11 }
  0x95   : > { %1790 = shalt.err (!%p1787_p12)
}
  0x96   : > { %1578 = dma.hbm_to_vmem [thread:$0]  (!%p2232_p9), %s2226_s5, 128, %s2221_s23, %s348_s8  }
  0x97   : > { %p2583_p2 = scmp.ne.s32.totalorder %s2573_s21, 0 }
  0x98   : > { %s2264_s7 = sand.u32 (!%p2583_p2), 1, %s1933_s10   ;;  %p2584_p13 = scmp.ne.s32.totalorder (!%p2583_p2), %s2570_s19, 0 }
  0x99   : > { %369 = sbr.rel (%p2583_p2) target bundleno = 612 (0x264), region = 48  ;;  %s1395_s20 = sshll.u32 (!%p2583_p2), %s2264_s7, 3 }
  0x9a   : > { %s372_s1 = scalar_lea.sflag (!%p2583_p2), [#allocation3], %s2264_s7  ;;  %s2268_s3 = scalar_lea.vmem (!%p2583_p2), [#allocation2], %s1395_s20 }
  0xa0   : > { %1908 = dma.done.wait (%p2584_p13), %s372_s1, 128  }
  0xa1   : > { %1910 = vsyncadd (%p2584_p13), %s372_s1, 4294967168  ;;  %p2585_p9 = scmp.eq.s32.totalorder %s2070_s17, 0 }
  0xa3   : > { %1912 = dma.done.wait (%p2585_p9), [#allocation6], 2048   ;;  %p2586_p6 = pmov %p2585_p9 }
  0xa5   : > { %1914 = vsyncadd (%p2586_p6), [#allocation6], 4294965248  ;;  %p2587_p0 = pmov %p2586_p6 }
  0xa7   : > { %1916 = dma.done.wait (%p2587_p0), [#allocation9], 1024   ;;  %p2588_p10 = pmov %p2587_p0 }
  0xa8   : > { %v1965_v0 = vmov 0.0|0.0   ;;  %vm1966_vm0 = vmmov 0   ;;  %v1967_v1 = vmov 0.0   ;;  %v433_v2 = vld [vmem:[#allocation5] sm:$0xff]  ;;  %v434_v3 = vld [vmem:[#allocation5 + $0x8] sm:$0xff]  ;;  %v435_v7 = vld [vmem:[#allocation5 + $0x10] sm:$0xff]  ;;  %v537_v53 = vlaneseq }
  0xa9   : > { %1918 = vsyncadd (%p2588_p10), [#allocation9], 4294966272  ;;  %1509 = vmatprep.subr.bf16.mxu0 %v1965_v0  ;;  %1521 = vmatprep.subr.bf16.mxu1 %v1965_v0  ;;  %v673_v4 = vld [vmem:[#allocation7] sm:$0xff]  ;;  %v1510_v5 = vpack.c.bf16 %v434_v3, %v433_v2  ;;  %v674_v6 = vld [vmem:[#allocation7 + $0x8] sm:$0xff]  ;;  %vm448_vm1 = vcmask 523264   ;;  %s1968_s12 = smov 80  }
  0xaa   : > { %1468 = vmatprep.mubr.msk.f32.mxu0 %vm1966_vm0, %v1967_v1  ;;  %1487 = vmatprep.mubr.msk.f32.mxu1 %vm1966_vm0, %v1967_v1  ;;  %v436_v8 = vld [vmem:[#allocation5 + $0x18] sm:$0xff]  ;;  %v1522_v9 = vpack.c.bf16 %v674_v6, %v673_v4  ;;  %v675_v10 = vld [vmem:[#allocation7 + $0x10] sm:$0xff]  ;;  %v437_v14 = vld [vmem:[#allocation5 + $0x20] sm:$0xff]  ;;  %s1969_s8 = smov 112   ;;  %s1970_s28 = smov 96   ;;  %v538_v55 = vshrl.u32 %v537_v53, 7 }
  0xab   : > { %v676_v11 = vld [vmem:[#allocation7 + $0x18] sm:$0xff]  ;;  %1511 = vmatpush3.bf16.msra.mxu0 %v1510_v5  ;;  %v1513_v12 = vpack.c.bf16 %v436_v8, %v435_v7  ;;  %v438_v15 = vld [vmem:[#allocation5 + $0x28] sm:$0xff]  ;;  %v677_v16 = vld [vmem:[#allocation7 + $0x20] sm:$0xff]  ;;  %v1971_v51 = vmov 1983009808   ;;  %s2589_s18 = sld [smem:[#allocation21_spill]] }
  0xac   : > { %1523 = vmatpush3.bf16.msra.mxu1 %v1522_v9  ;;  %1512 = vmatprep.subr.bf16.mxu0 %v1965_v0  ;;  %v1525_v13 = vpack.c.bf16 %v676_v11, %v675_v10  ;;  %v678_v17 = vld [vmem:[#allocation7 + $0x28] sm:$0xff]  ;;  %v1516_v18 = vpack.c.bf16 %v438_v15, %v437_v14  ;;  %v439_v20 = vld [vmem:[#allocation5 + $0x30] sm:$0xff]  ;;  %v440_v21 = vld [vmem:[#allocation5 + $0x38] sm:$0xff]  ;;  %v535_v52 = vunpack.c.l.s4 %v1971_v51  ;;  %v1972_v56 = vmov 1934713408   ;;  %s2590_s25 = sld [smem:[#allocation20_spill]] }
  0xad   : > { %1524 = vmatprep.subr.bf16.mxu1 %v1965_v0  ;;  %v1528_v19 = vpack.c.bf16 %v678_v17, %v677_v16  ;;  %v679_v22 = vld [vmem:[#allocation7 + $0x30] sm:$0xff]  ;;  %v680_v23 = vld [vmem:[#allocation7 + $0x38] sm:$0xff]  ;;  %v1519_v24 = vpack.c.bf16 %v440_v21, %v439_v20  ;;  %v908_v26 = vld [vmem:[#allocation8] sm:$0xff]  ;;  %v567_v57 = vunpack.c.l.s4 %v1972_v56  ;;  %vm668_vm2 = vcmask 130048   ;;  %s2333_s30 = sshll.u32 %s2264_s7, 5  ;;  %s1148_s1 = sand.u32 1, %s2070_s17  }
  0xae   : > { %v1531_v25 = vpack.c.bf16 %v680_v23, %v679_v22  ;;  %v909_v27 = vld [vmem:[#allocation8 + $0x8] sm:$0xff]  ;;  %v432_v28 = vld [vmem:[%s2268_s3] sm:$0xff]  ;;  %v912_v33 = vld [vmem:[#allocation8 + $0x20] sm:$0xff]  ;;  %v536_v54 = vunpack.c.0.s8 %v535_v52  ;;  %s424_s5 = scalar_lea.vmem [#allocation11], %s2333_s30  ;;  %s2375_s29 = scalar_lea.vmem [#allocation10], %s2333_s30 }
  0xaf   : > { %1514 = vmatpush3.bf16.msra.mxu0 %v1513_v12  ;;  %v1534_v29 = vpack.c.bf16 %v909_v27, %v908_v26  ;;  %v910_v30 = vld [vmem:[#allocation8 + $0x10] sm:$0xff]  ;;  %v911_v31 = vld [vmem:[#allocation8 + $0x18] sm:$0xff]  ;;  %v913_v34 = vld [vmem:[#allocation8 + $0x28] sm:$0xff]  ;;  %v568_v63 = vunpack.c.0.s8 %v567_v57  ;;  %s1185_s19 = sshll.u32 %s424_s5, 4  ;;  %s1168_s22 = sshll.u32 %s2375_s29, 4  ;;  %s2364_s19 = int_to_ptr.vmem [resolvable:$true] %s1185_s19  ;;  %s2423_s22 = int_to_ptr.vmem [resolvable:$true] %s1168_s22 }
  0xb0   : > { %1526 = vmatpush3.bf16.msra.mxu1 %v1525_v13  ;;  %1515 = vmatprep.subr.bf16.mxu0 %v1965_v0  ;;  %v1537_v32 = vpack.c.bf16 %v911_v31, %v910_v30  ;;  %v1540_v35 = vpack.c.bf16 %v913_v34, %v912_v33  ;;  %v914_v36 = vld [vmem:[#allocation8 + $0x30] sm:$0xff]  ;;  %v915_v37 = vld [vmem:[#allocation8 + $0x38] sm:$0xff]  ;;  %v2315_v60 = vsub.s32 %v536_v54, %v538_v55 }
  0xb1   : > { %1527 = vmatprep.subr.bf16.mxu1 %v1965_v0  ;;  %v1543_v38 = vpack.c.bf16 %v915_v37, %v914_v36  ;;  %v1406_v39 = vld [vmem:[%s2544_s4] ss:$0 sm:$0xff]  ;;  %v2319_v6 = vsub.s32 %v568_v63, %v538_v55  ;;  %s1417_s27 = sshll.u32 %s2589_s18, 3  ;;  %s2384_s18 = scalar_lea.sflag [#allocation12], %s1148_s1 }
  0xb2   : > { %v1402_v45 = vld [vmem:[%s2542_s2] ss:$0 sm:$0xff]  ;;  %s1165_s20 = sadd.s32 %s2590_s25, %s1417_s27  ;;  %s1791_s25 = scalar_lea.vmem %s2364_s19, 512 }
  0xb3   : > { %1517 = vmatpush3.bf16.msra.mxu0 %v1516_v18  ;;  %v1410_v47 = vld [vmem:[%s2546_s6] ss:$0 sm:$0xff]  ;;  %s2347_s3 = sshll.u32 %s1165_s20, 7  ;;  %p1792_p5 = scmp.ne.s32.totalorder %s2364_s19, %s1791_s25 }
  0xb4   : > { %1529 = vmatpush3.bf16.msra.mxu1 %v1528_v19  ;;  %1518 = vmatprep.subr.bf16.mxu0 %v1965_v0  ;;  %s1973_s27 = smov [#allocation11]  }
  0xb5   : > { %1530 = vmatprep.subr.bf16.mxu1 %v1965_v0  ;;  %p1793_p7 = pnand %p1792_p5, %p2202_p3  ;;  %s1795_s20 = sshll.u32 %s1973_s27, 4  ;;  %s1796_s20 = int_to_ptr.vmem [resolvable:$false] %s1795_s20 }
  0xb6   : > { %p1798_p1 = scmp.lt.s32.totalorder %s2364_s19, %s1796_s20 }
  0xb7   : > { %1520 = vmatpush3.bf16.msra.mxu0 %v1519_v24  ;;  %p1794_p11 = pneg %p1793_p7 }
  0xb8   : > { %1532 = vmatpush3.bf16.msra.mxu1 %v1531_v25  ;;  %1533 = vmatprep.subr.bf16.mxu0 %v1965_v0 }
  0xba   : > { %1469 = vmatmul.mubr.msk.f32.vlgmr.msra.gmra.mrb[0].mxu0 %vm448_vm1, %v432_v28 }
  0xbb   : > { %1488 = vmatmul.mubr.msk.f32.vlgmr.msra.gmra.mrb[0].mxu1 %vm448_vm1, %v432_v28  ;;  %1535 = vmatpush3.bf16.msra.mxu0 %v1534_v29 }
  0xbc   : > { %1536 = vmatprep.subr.bf16.mxu0 %v1965_v0  ;;  %1506 = vmatprep.mubr.msk.f32.mxu0 %vm1966_vm0, %v1967_v1 }
  0xbf   : > { %1538 = vmatpush3.bf16.msra.mxu0 %v1537_v32 }
  0xc0   : > { %1539 = vmatprep.subr.bf16.mxu0 %v1965_v0 }
  0xc3   : > { %1541 = vmatpush3.bf16.msra.mxu0 %v1540_v35 }
  0xc4   : > { %1542 = vmatprep.subr.bf16.mxu0 %v1965_v0 }
  0xc7   : > { %1544 = vmatpush3.bf16.msra.mxu0 %v1543_v38 }
  0xca   : > { %1507 = vmatmul.mubr.msk.f32.vlgmr.msra.gmra.mrb[2].mxu0 %vm448_vm1, %v432_v28 }
 0x18d   : > { %v518_v40 = vpop.f32.mrb[0].mxu0 }
 0x18e   : > { %v754_v41 = vpop.f32.mrb[0].mxu1  ;;  %v1470_v42 = vpop.f32.mrb[1].mxu0  ;;  %v519_v46 = vadd.f32 %v1402_v45, %v518_v40 }
 0x18f   : > { %v755_v43 = vadd.f32 %v1406_v39, %v754_v41  ;;  %v1489_v44 = vpop.f32.mrb[1].mxu1 }
 0x191   : > { %765 = vrot.lane.b32.xlu1 %v755_v43, %s1968_s12  ;;  %759 = vrot.lane.b32.xlu0 %v755_v43, %s1969_s8 }
 0x195   : > { %762 = vrot.lane.b32.xlu0 %v755_v43, %s1970_s28  ;;  %523 = vrot.lane.b32.xlu1 %v519_v46, %s1969_s8 }
 0x199   : > { %526 = vrot.lane.b32.xlu0 %v519_v46, %s1970_s28  ;;  %529 = vrot.lane.b32.xlu1 %v519_v46, %s1968_s12 }
 0x19d   : > { %v989_v48 = vpop.f32.mrb[2].mxu0 }
 0x19e   : > { %v2310_v49 = vadd.f32 %v1410_v47, %v989_v48  ;;  %v1508_v50 = vpop.f32.mrb[3].mxu0 }
 0x1a0   : > { %997 = vrot.lane.b32.xlu1 %v2310_v49, %s1970_s28  ;;  %994 = vrot.lane.b32.xlu0 %v2310_v49, %s1969_s8 }
 0x1a4   : > { %1000 = vrot.lane.b32.xlu0 %v2310_v49, %s1968_s12  ;;  %s2591_s12 = sld [smem:[#allocation27_spill]] }
 0x1aa   : > { %s2592_s8 = smov %s2591_s12  ;;  %s2362_s28 = scalar_lea.hbm %s2591_s12, %s2347_s3 }
 0x203   : > { %v766_v58 = vpop.permute.xlu1 %765  ;;  %v760_v59 = vpop.permute.xlu0 %759 }
 0x204   : > { %v784_v61 = vcombine.low %v760_v59, %v766_v58  ;;  %v785_v62 = vcombine.high %v760_v59, %v766_v58 }
 0x206   : > { %v792_v2 = vrot.slane %v784_v61, %v2315_v60  ;;  %v799_v3 = vrot.slane %v785_v62, %v2315_v60 }
 0x207   : > { %v763_v0 = vpop.permute.xlu0 %762  ;;  %v524_v1 = vpop.permute.xlu1 %523 }
 0x208   : > { %v768_v4 = vcombine.low %v755_v43, %v763_v0  ;;  %v769_v5 = vcombine.high %v755_v43, %v763_v0 }
 0x20a   : > { %v776_v7 = vrot.slane %v768_v4, %v2315_v60  ;;  %v783_v8 = vrot.slane %v769_v5, %v2315_v60 }
 0x20b   : > { %v527_v9 = vpop.permute.xlu0 %526  ;;  %v530_v10 = vpop.permute.xlu1 %529 }
 0x20c   : > { %v800_v11 = vcombine.low %v776_v7, %v792_v2  ;;  %v801_v12 = vcombine.high %v776_v7, %v792_v2  ;;  %v816_v13 = vcombine.low %v783_v8, %v799_v3  ;;  %v817_v14 = vcombine.high %v783_v8, %v799_v3 }
 0x20d   : > { %v532_v15 = vcombine.low %v519_v46, %v527_v9  ;;  %v533_v16 = vcombine.high %v519_v46, %v527_v9  ;;  %v548_v17 = vcombine.low %v524_v1, %v530_v10  ;;  %v549_v18 = vcombine.high %v524_v1, %v530_v10 }
 0x20e   : > { %v808_v19 = vrot.slane %v800_v11, %v2319_v6  ;;  %v815_v20 = vrot.slane %v801_v12, %v2319_v6  ;;  %v824_v21 = vrot.slane %v816_v13, %v2319_v6  ;;  %v831_v22 = vrot.slane %v817_v14, %v2319_v6 }
 0x20f   : > { %v540_v23 = vrot.slane %v532_v15, %v2315_v60  ;;  %v547_v24 = vrot.slane %v533_v16, %v2315_v60  ;;  %v556_v25 = vrot.slane %v548_v17, %v2315_v60  ;;  %v563_v26 = vrot.slane %v549_v18, %v2315_v60 }
 0x210   : > { %v836_v27 = vcombine.low %v808_v19, %v815_v20  ;;  %v1408_v28 = vcombine.high %v808_v19, %v815_v20  ;;  %v852_v29 = vcombine.low %v824_v21, %v831_v22  ;;  %v1409_v30 = vcombine.high %v824_v21, %v831_v22 }
 0x211   : > { %v564_v31 = vcombine.low %v540_v23, %v556_v25  ;;  %v565_v32 = vcombine.high %v540_v23, %v556_v25  ;;  %v580_v33 = vcombine.low %v547_v24, %v563_v26  ;;  %v581_v34 = vcombine.high %v547_v24, %v563_v26 }
 0x212   : > { %v843_v35 = vrot.slane %v836_v27, %v2315_v60  ;;  %v851_v36 = vrot.slane %v1408_v28, %v2315_v60  ;;  %v859_v37 = vrot.slane %v852_v29, %v2315_v60  ;;  %v867_v38 = vrot.slane %v1409_v30, %v2315_v60  ;;  %v2339_v39 = vpop.permute.xlu0 %994  ;;  %v998_v62 = vpop.permute.xlu1 %997 }
 0x213   : > { %v572_v40 = vrot.slane %v564_v31, %v2319_v6  ;;  %v579_v41 = vrot.slane %v565_v32, %v2319_v6  ;;  %v588_v42 = vrot.slane %v580_v33, %v2319_v6  ;;  %v595_v43 = vrot.slane %v581_v34, %v2319_v6 }
 0x214   : > { %v868_v44 = vcombine.low %v843_v35, %v851_v36  ;;  %v869_v45 = vcombine.high %v843_v35, %v851_v36  ;;  %v884_v46 = vcombine.low %v859_v37, %v867_v38  ;;  %v885_v47 = vcombine.high %v859_v37, %v867_v38 }
 0x215   : > { %v600_v48 = vcombine.low %v572_v40, %v579_v41  ;;  %v1404_v50 = vcombine.high %v572_v40, %v579_v41  ;;  %v616_v51 = vcombine.low %v588_v42, %v595_v43  ;;  %v1405_v52 = vcombine.high %v588_v42, %v595_v43 }
 0x216   : > { %v876_v53 = vrot.slane %v868_v44, %v2319_v6  ;;  %v883_v54 = vrot.slane %v869_v45, %v2319_v6  ;;  %v892_v55 = vrot.slane %v884_v46, %v2319_v6  ;;  %v899_v56 = vrot.slane %v885_v47, %v2319_v6  ;;  %v1001_v63 = vpop.permute.xlu0 %1000 }
 0x217   : > { %v607_v57 = vrot.slane %v600_v48, %v2315_v60  ;;  %v615_v58 = vrot.slane %v1404_v50, %v2315_v60  ;;  %v623_v59 = vrot.slane %v616_v51, %v2315_v60  ;;  %v631_v61 = vrot.slane %v1405_v52, %v2315_v60 }
 0x218   : > { %v900_v0 = vcombine.low %v876_v53, %v892_v55  ;;  %v901_v1 = vcombine.high %v876_v53, %v892_v55  ;;  %v902_v2 = vcombine.low %v883_v54, %v899_v56  ;;  %v903_v3 = vcombine.high %v883_v54, %v899_v56 }
 0x219   : > { %v632_v4 = vcombine.low %v607_v57, %v615_v58  ;;  %v633_v5 = vcombine.high %v607_v57, %v615_v58  ;;  %v648_v7 = vcombine.low %v623_v59, %v631_v61  ;;  %v649_v8 = vcombine.high %v623_v59, %v631_v61 }
 0x21a   : > { %904 = vst.msk [vmem:[%s424_s5] sm:$0xff] %vm668_vm2, %v900_v0  ;;  %905 = vst.msk [vmem:[%s424_s5 + $0x8] sm:$0xff] %vm668_vm2, %v901_v1  ;;  %v1003_v9 = vcombine.low %v2310_v49, %v998_v62  ;;  %v1004_v10 = vcombine.high %v2310_v49, %v998_v62  ;;  %v1019_v11 = vcombine.low %v2339_v39, %v1001_v63 }
 0x21b   : > { %906 = vst.msk [vmem:[%s424_s5 + $0x10] sm:$0xff] %vm668_vm2, %v902_v2  ;;  %907 = vst.msk [vmem:[%s424_s5 + $0x18] sm:$0xff] %vm668_vm2, %v903_v3  ;;  %v1020_v12 = vcombine.high %v2339_v39, %v1001_v63  ;;  %v640_v13 = vrot.slane %v632_v4, %v2319_v6  ;;  %v647_v14 = vrot.slane %v633_v5, %v2319_v6  ;;  %s1797_s5 = scalar_lea.vmem %s1796_s20, 1024 }
 0x21c   : > { %v656_v15 = vrot.slane %v648_v7, %v2319_v6  ;;  %v663_v16 = vrot.slane %v649_v8, %v2319_v6  ;;  %p1799_p4 = scmp.lt.s32.totalorder %s1797_s5, %s1791_s25 }
 0x21e   : > { %p1800_p8 = por %p1799_p4, %p1798_p1 }
 0x220   : > { %p1801_p12 = pnand %p1800_p8, %p1794_p11 }
 0x222   : > { %1804 = shalt.err (!%p1801_p12)
}
 0x223   : > { %s1805_s17 = scalar_lea.hbm %s2362_s28, 512  ;;  %s1809_s23 = scalar_lea.hbm %s2592_s8, 2048 }
 0x224   : > { %p1806_p2 = scmp.ne.s32.totalorder %s2362_s28, %s1805_s17  ;;  %p1810_p6 = scmp.lt.u32.totalorder %s2362_s28, %s2592_s8 }
 0x225   : > { %p1811_p0 = scmp.lt.u32.totalorder %s1809_s23, %s1805_s17  ;;  %p1813_p5 = scmp.lt.u32.totalorder %s1805_s17, %s2362_s28 }
 0x226   : > { %p1807_p13 = pnand %p1806_p2, %p2202_p3 }
 0x227   : > { %p1812_p10 = por %p1811_p0, %p1810_p6 }
 0x228   : > { %p1808_p9 = pneg %p1807_p13 }
 0x229   : > { %p1814_p7 = por %p1813_p5, %p1812_p10 }
 0x22b   : > { %p1815_p11 = pnand %p1814_p7, %p1808_p9 }
 0x22d   : > { %1818 = shalt.err (!%p1815_p11)
}
 0x22e   : > { %s2559_s25 = smov 128   ;;  %s1975_s20 = smov 256   ;;  %v1011_v49 = vrot.slane %v1003_v9, %v2315_v60  ;;  %v1018_v17 = vrot.slane %v1004_v10, %v2315_v60  ;;  %v1027_v18 = vrot.slane %v1019_v11, %v2315_v60  ;;  %v1034_v19 = vrot.slane %v1020_v12, %v2315_v60 }
 0x22f   : > { %s1976_s5 = smov 8   ;;  %v664_v20 = vcombine.low %v640_v13, %v656_v15  ;;  %v665_v21 = vcombine.high %v640_v13, %v656_v15  ;;  %v666_v22 = vcombine.low %v647_v14, %v663_v16  ;;  %v667_v23 = vcombine.high %v647_v14, %v663_v16  ;;  %s2593_s21 = sld [smem:[#allocation26_spill]] }
 0x230   : > { %1560 = dma.vmem_to_hbm [thread:$0]  (%p2202_p3), %s2364_s19, 512, %s2362_s28, %s2384_s18, %s2559_s25, %s1975_s20, %s1976_s5   ;;  %v1035_v24 = vcombine.low %v1011_v49, %v1027_v18  ;;  %v1036_v25 = vcombine.high %v1011_v49, %v1027_v18  ;;  %v1051_v26 = vcombine.low %v1018_v17, %v1034_v19  ;;  %v1052_v27 = vcombine.high %v1018_v17, %v1034_v19 }
 0x231   : > { %669 = vst.msk [vmem:[%s2375_s29] sm:$0xff] %vm668_vm2, %v664_v20  ;;  %670 = vst.msk [vmem:[%s2375_s29 + $0x8] sm:$0xff] %vm668_vm2, %v665_v21  ;;  %s1819_s23 = scalar_lea.vmem %s2423_s22, 512  ;;  %s1977_s12 = smov [#allocation10]  }
 0x232   : > { %671 = vst.msk [vmem:[%s2375_s29 + $0x10] sm:$0xff] %vm668_vm2, %v666_v22  ;;  %672 = vst.msk [vmem:[%s2375_s29 + $0x18] sm:$0xff] %vm668_vm2, %v667_v23  ;;  %v1043_v28 = vrot.slane %v1035_v24, %v2319_v6  ;;  %v1050_v29 = vrot.slane %v1036_v25, %v2319_v6  ;;  %v1059_v30 = vrot.slane %v1051_v26, %v2319_v6  ;;  %p1820_p1 = scmp.ne.s32.totalorder %s2423_s22, %s1819_s23  ;;  %s1823_s27 = sshll.u32 %s1977_s12, 4  ;;  %s1824_s27 = int_to_ptr.vmem [resolvable:$false] %s1823_s27 }
 0x233   : > { %v1066_v31 = vrot.slane %v1052_v27, %v2319_v6  ;;  %s1825_s17 = scalar_lea.vmem %s1824_s27, 1024  ;;  %p1826_p12 = scmp.lt.s32.totalorder %s2423_s22, %s1824_s27 }
 0x234   : > { %p1821_p4 = pnand %p1820_p1, %p2202_p3  ;;  %p1827_p2 = scmp.lt.s32.totalorder %s1825_s17, %s1819_s23 }
 0x235   : > { %s2419_s19 = scalar_lea.hbm %s2593_s21, %s2347_s3 }
 0x236   : > { %p1822_p8 = pneg %p1821_p4  ;;  %p1828_p13 = por %p1827_p2, %p1826_p12 }
 0x238   : > { %p1829_p9 = pnand %p1828_p13, %p1822_p8 }
 0x23a   : > { %1832 = shalt.err (!%p1829_p9)
}
 0x23b   : > { %s1833_s29 = scalar_lea.hbm %s2419_s19, 512  ;;  %s1837_s12 = scalar_lea.hbm %s2593_s21, 2048 }
 0x23c   : > { %p1834_p6 = scmp.ne.s32.totalorder %s2419_s19, %s1833_s29  ;;  %p1838_p5 = scmp.lt.u32.totalorder %s2419_s19, %s2593_s21 }
 0x23d   : > { %p1839_p7 = scmp.lt.u32.totalorder %s1837_s12, %s1833_s29  ;;  %p1841_p1 = scmp.lt.u32.totalorder %s1833_s29, %s2419_s19 }
 0x23e   : > { %p1835_p0 = pnand %p1834_p6, %p2202_p3 }
 0x23f   : > { %p1840_p11 = por %p1839_p7, %p1838_p5 }
 0x240   : > { %p1836_p10 = pneg %p1835_p0 }
 0x241   : > { %p1842_p4 = por %p1841_p1, %p1840_p11 }
 0x243   : > { %p1843_p8 = pnand %p1842_p4, %p1836_p10 }
 0x245   : > { %1846 = shalt.err (!%p1843_p8)
}
 0x246   : > { %s2594_s23 = smov 128   ;;  %s2595_s17 = scalar_lea.sflag [#allocation4], %s2264_s7  ;;  %v1071_v32 = vcombine.low %v1043_v28, %v1050_v29  ;;  %v1412_v33 = vcombine.high %v1043_v28, %v1050_v29  ;;  %v1087_v34 = vcombine.low %v1059_v30, %v1066_v31  ;;  %v1413_v35 = vcombine.high %v1059_v30, %v1066_v31 }
 0x247   : > { %1559 = dma.vmem_to_hbm [thread:$0]  (%p2202_p3), %s2423_s22, 512, %s2419_s19, %s2595_s17, %s2594_s23, %s1975_s20, %s1976_s5  }
 0x248   : > { %v1078_v36 = vrot.slane %v1071_v32, %v2315_v60  ;;  %v1086_v37 = vrot.slane %v1412_v33, %v2315_v60  ;;  %v1094_v38 = vrot.slane %v1087_v34, %v2315_v60  ;;  %v1102_v39 = vrot.slane %v1413_v35, %v2315_v60  ;;  %s431_s7 = scalar_lea.vmem [#allocation13], %s2333_s30  ;;  %s2596_s28 = sld [smem:[#allocation28_spill]] }
 0x249   : > { %s1202_s25 = sshll.u32 %s431_s7, 4  ;;  %s2479_s25 = int_to_ptr.vmem [resolvable:$true] %s1202_s25 }
 0x24a   : > { %v1103_v40 = vcombine.low %v1078_v36, %v1086_v37  ;;  %v1104_v41 = vcombine.high %v1078_v36, %v1086_v37  ;;  %v1119_v42 = vcombine.low %v1094_v38, %v1102_v39  ;;  %v1120_v43 = vcombine.high %v1094_v38, %v1102_v39  ;;  %s1847_s30 = scalar_lea.vmem %s2479_s25, 512 }
 0x24b   : > { %p1848_p12 = scmp.ne.s32.totalorder %s2479_s25, %s1847_s30 }
 0x24c   : > { %v1111_v44 = vrot.slane %v1103_v40, %v2319_v6  ;;  %v1118_v45 = vrot.slane %v1104_v41, %v2319_v6  ;;  %v1127_v46 = vrot.slane %v1119_v42, %v2319_v6  ;;  %v1134_v47 = vrot.slane %v1120_v43, %v2319_v6 }
 0x24d   : > { %p1849_p2 = pnand %p1848_p12, %p2202_p3 }
 0x24e   : > { %v1135_v48 = vcombine.low %v1111_v44, %v1127_v46  ;;  %v1136_v50 = vcombine.high %v1111_v44, %v1127_v46  ;;  %v1137_v51 = vcombine.low %v1118_v45, %v1134_v47  ;;  %v1138_v52 = vcombine.high %v1118_v45, %v1134_v47  ;;  %s2477_s29 = scalar_lea.hbm %s2596_s28, %s2347_s3  ;;  %s1978_s3 = smov [#allocation13]  }
 0x24f   : > { %p1850_p13 = pneg %p1849_p2  ;;  %s1851_s1 = sshll.u32 %s1978_s3, 4  ;;  %s1852_s1 = int_to_ptr.vmem [resolvable:$false] %s1851_s1 }
 0x250   : > { %1139 = vst.msk [vmem:[%s431_s7] sm:$0xff] %vm668_vm2, %v1135_v48  ;;  %1140 = vst.msk [vmem:[%s431_s7 + $0x8] sm:$0xff] %vm668_vm2, %v1136_v50  ;;  %s1853_s12 = scalar_lea.vmem %s1852_s1, 1024  ;;  %p1854_p9 = scmp.lt.s32.totalorder %s2479_s25, %s1852_s1 }
 0x251   : > { %1141 = vst.msk [vmem:[%s431_s7 + $0x10] sm:$0xff] %vm668_vm2, %v1137_v51  ;;  %1142 = vst.msk [vmem:[%s431_s7 + $0x18] sm:$0xff] %vm668_vm2, %v1138_v52  ;;  %p1855_p6 = scmp.lt.s32.totalorder %s1853_s12, %s1847_s30 }
 0x253   : > { %p1856_p0 = por %p1855_p6, %p1854_p9 }
 0x255   : > { %p1857_p10 = pnand %p1856_p0, %p1850_p13 }
 0x257   : > { %1860 = shalt.err (!%p1857_p10)
}
 0x258   : > { %s1861_s27 = scalar_lea.hbm %s2477_s29, 512  ;;  %s1865_s22 = scalar_lea.hbm %s2596_s28, 2048 }
 0x259   : > { %p1862_p5 = scmp.ne.s32.totalorder %s2477_s29, %s1861_s27  ;;  %p1866_p1 = scmp.lt.u32.totalorder %s2477_s29, %s2596_s28 }
 0x25a   : > { %p1867_p4 = scmp.lt.u32.totalorder %s1865_s22, %s1861_s27  ;;  %p1869_p12 = scmp.lt.u32.totalorder %s1861_s27, %s2477_s29 }
 0x25b   : > { %p1863_p7 = pnand %p1862_p5, %p2202_p3 }
 0x25c   : > { %p1868_p8 = por %p1867_p4, %p1866_p1 }
 0x25d   : > { %p1864_p11 = pneg %p1863_p7 }
 0x25e   : > { %p1870_p2 = por %p1869_p12, %p1868_p8 }
 0x260   : > { %p1871_p13 = pnand %p1870_p2, %p1864_p11 }
 0x262   : > { %1874 = shalt.err (!%p1871_p13)
}
 0x263   : > { %1561 = dma.vmem_to_hbm [thread:$0]  (%p2202_p3), %s2479_s25, 512, %s2477_s29, %s2384_s18, %s2594_s23, %s1975_s20, %s1976_s5  }
 0x264 PF: > { %s2597_s30 = sld [smem:[#allocation19_spill]]  ;;  %s2598_s1 = sld [smem:[#allocation22_spill]] }
 0x265   : > { %p1596_p9 = scmp.ge.s32.totalorder %s1957_s16, 2 }
 0x26a   : > { %s1217_s12 = sand.u32 1, %s2597_s30   ;;  %p2599_p6 = scmp.ne.s32.totalorder %s2598_s1, 0 }
 0x26b   : > { %s1218_s27 = scalar_lea.sflag [#allocation4], %s1217_s12 }
 0x26c   : > { %p1580_p0 = pnand %p1596_p9, %p2599_p6 }
 0x26e   : > { %1920 = dma.done.wait (!%p1580_p0), %s1218_s27, 512  }
 0x26f   : > { %1922 = vsyncadd (!%p1580_p0), %s1218_s27, 4294966784  ;;  %s2600_s13 = sadd.s32 4294967294, %s1957_s16  }
 0x270   : > { %s1226_s17 = sand.u32 1, %s2600_s13  }
 0x271   : > { %s1227_s7 = scalar_lea.sflag [#allocation12], %s1226_s17 }
 0x272   : > { %1924 = dma.done.wait (!%p1580_p0), %s1227_s7, 1024  }
 0x273   : > { %1926 = vsyncadd (!%p1580_p0), %s1227_s7, 4294966272  ;;  %s31_s16 = sadd.s32 1, %s1957_s16   ;;  %s2601_s30 = smov %s1933_s10 }
 0x274   : > { %p28_p3 = scmp.ge.s32.totalorder %s31_s16, 6   ;;  %s2602_s10 = smov %s1937_s11 }
 0x275   : > { %s2603_s11 = smov %s2219_s26  ;;  %s2604_s12 = smov %s1949_s14 }
 0x276   : > { %s2605_s13 = smov %s1953_s15  ;;  %s2606_s14 = smov %s2609_s9 }
 0x277   : > { %s2607_s15 = smov %s2613_s24  ;;  %30 = sbr.rel (!%p28_p3) target bundleno = 18 (0x12), region = 137 }
 0x27e   :  { %1241 = vsyncpa [#allocation3], 1 }
 0x27f   :  { %1243 = vsyncpa [#allocation3 + $0x1], 1 }
 0x280   :  { %1244 = vsyncpa [#allocation6], 1 }
 0x281   :  { %1245 = vsyncpa [#allocation9], 1 }
 0x282   :  { %1246 = vsyncpa [#allocation4], 1 }
 0x283   :  { %1248 = vsyncpa [#allocation4 + $0x1], 1 }
 0x284   :  { %1249 = vsyncpa [#allocation12], 1 }
 0x285   :  { %1251 = vsyncpa [#allocation12 + $0x1], 1 }

</bundles_post_ra>
